<compile_context>
chip_gen: v5e
topology: v5e:2x2
jax: 0.10.0
libtpu: 0.0.40
codegen_flags: <defaults>
</compile_context>

<pallas_src>
import jax
import jax.numpy as jnp
from jax.experimental import pallas as pl
from jax.experimental.pallas import tpu as pltpu

# ---- "Config" (small, synthetic, consistent with the module) ----------------
LSTM_UNIT_SIZE = 32                    # Config.LSTM_UNIT_SIZE  (feature_dim)
LABEL_SIZE_LIST = [8, 8, 8, 8]         # Config.LABEL_SIZE_LIST
ACTION_DIM = sum(LABEL_SIZE_LIST)      # 32
IN_DIM = LSTM_UNIT_SIZE + ACTION_DIM   # 64
HIDDEN = 256
OUT_COLS = 8                           # narrow fused output (q1 -> col 0, q2 -> col 1)
BATCH = 8
BM_CAP = 1024                          # max rows per grid step


def _double_q_kernel(state_ref, action_ref,
                     w1_state_ref, w1_action_ref, b1_ref,
                     w2q1_ref, b2q1_ref, w2q2_ref, b2q2_ref,
                     w3q1_ref, w3q2_ref, b3_ref,
                     q_ref):
    s = state_ref[...]                         # (bm, 32) bf16
    a = action_ref[...]                        # (bm, 32) bf16

    # Fused layer 1 for both branches: (bm, 512), f32 accumulate, f32 bias/ReLU.
    h1 = (jnp.dot(s, w1_state_ref[...], preferred_element_type=jnp.float32)
          + jnp.dot(a, w1_action_ref[...], preferred_element_type=jnp.float32)
          + b1_ref[...])
    h1 = jnp.maximum(h1, 0.0).astype(jnp.bfloat16)
    h1q1 = h1[:, :HIDDEN]                      # branch-a hidden, (bm, 256)
    h1q2 = h1[:, HIDDEN:]                      # branch-b hidden, (bm, 256)

    # Layer 2, per branch (separate 256x256 weights, N=256 fills the MXU).
    h2q1 = jnp.maximum(
        jnp.dot(h1q1, w2q1_ref[...], preferred_element_type=jnp.float32)
        + b2q1_ref[...], 0.0).astype(jnp.bfloat16)
    h2q2 = jnp.maximum(
        jnp.dot(h1q2, w2q2_ref[...], preferred_element_type=jnp.float32)
        + b2q2_ref[...], 0.0).astype(jnp.bfloat16)

    # Fused narrow layer 3: w3q1 holds the real (256,1) weight in column 0,
    # w3q2 in column 1; remaining columns zero.  One (bm, 8) store -> only
    # 32 B/row HBM writeback.
    q_ref[...] = (jnp.dot(h2q1, w3q1_ref[...], preferred_element_type=jnp.float32)
                  + jnp.dot(h2q2, w3q2_ref[...], preferred_element_type=jnp.float32)
                  + b3_ref[...])


def _pick_bm(B):
    """Batch-tile rows per grid step.

    B <= 256: one block containing the whole batch.
    B  > 256: >= 2 grid steps (v7x megacore sharding via the 'parallel' axis),
              tiles rounded up to a multiple of 256 rows, capped at BM_CAP.
    """
    if B <= 256:
        return B
    half = -(-B // 2)                  # cdiv(B, 2)
    bm = -(-half // 256) * 256         # round up to a multiple of 256
    return min(BM_CAP, bm)


def _forward_impl(state_feature, action, packed_params):
    """state_feature: (B, 32), action: (B, 32) -> (q1, q2), each (B, 1)."""
    # Feed inputs as bf16: halves input HBM read, removes in-kernel casts.
    state_feature = state_feature.astype(jnp.bfloat16)
    action = action.astype(jnp.bfloat16)
    B = state_feature.shape[0]
    bm = _pick_bm(B)
    grid = (pl.cdiv(B, bm),)

    (w1_state, w1_action, b1,
     w2q1, b2q1, w2q2, b2q2,
     w3q1, w3q2, b3) = packed_params

    def full_spec(arr):
        # weights / biases: same full block at every grid step (stay resident)
        return pl.BlockSpec(arr.shape, lambda i: (0, 0))

    in_specs = [
        pl.BlockSpec((bm, LSTM_UNIT_SIZE), lambda i: (i, 0)),   # state
        pl.BlockSpec((bm, ACTION_DIM), lambda i: (i, 0)),       # action
        full_spec(w1_state), full_spec(w1_action), full_spec(b1),
        full_spec(w2q1), full_spec(b2q1),
        full_spec(w2q2), full_spec(b2q2),
        full_spec(w3q1), full_spec(w3q2), full_spec(b3),
    ]
    out_specs = pl.BlockSpec((bm, OUT_COLS), lambda i: (i, 0))

    q_cat = pl.pallas_call(
        _double_q_kernel,
        out_shape=jax.ShapeDtypeStruct((B, OUT_COLS), jnp.float32),
        grid=grid,
        in_specs=in_specs,
        out_specs=out_specs,
        compiler_params=pltpu.CompilerParams(
            dimension_semantics=("parallel",)),
    )(state_feature, action,
      w1_state, w1_action, b1,
      w2q1, b2q1, w2q2, b2q2,
      w3q1, w3q2, b3)

    # Single narrow slice (fuses under jit), then split into (B,1) outputs.
    q12 = q_cat[:, :2]
    return q12[:, 0:1], q12[:, 1:2]


# Keep the whole forward (kernel + epilogue slice) under one jit so the
# wrapper slices fuse and the launch / weight handling is amortized.
one_double_q_forward = jax.jit(_forward_impl)


def init_params(key):
    """Original-form params. Weights (in, out) f32, biases (1, out) f32."""
    def linear(k, fan_in, fan_out):
        kw, kb = jax.random.split(k)
        bound = 1.0 / jnp.sqrt(fan_in)
        w = jax.random.uniform(kw, (fan_in, fan_out), jnp.float32, -bound, bound)
        b = jax.random.uniform(kb, (1, fan_out), jnp.float32, -bound, bound)
        return w, b

    keys = jax.random.split(key, 6)
    w1a, b1a = linear(keys[0], IN_DIM, HIDDEN)
    w2a, b2a = linear(keys[1], HIDDEN, HIDDEN)
    w3a, b3a = linear(keys[2], HIDDEN, 1)
    w1b, b1b = linear(keys[3], IN_DIM, HIDDEN)
    w2b, b2b = linear(keys[4], HIDDEN, HIDDEN)
    w3b, b3b = linear(keys[5], HIDDEN, 1)
    return (w1a, b1a, w2a, b2a, w3a, b3a,
            w1b, b1b, w2b, b2b, w3b, b3b)


def pack_params(params):
    """Fuse / pad / bf16-cast params into the kernel layout."""
    (w1a, b1a, w2a, b2a, w3a, b3a,
     w1b, b1b, w2b, b2b, w3b, b3b) = params

    # Layer 1: both branches fused along N, split along K into state/action rows.
    w1_full = jnp.concatenate([w1a, w1b], axis=1)                 # (64, 512)
    w1_state = w1_full[:LSTM_UNIT_SIZE].astype(jnp.bfloat16)      # (32, 512)
    w1_action = w1_full[LSTM_UNIT_SIZE:].astype(jnp.bfloat16)     # (32, 512)
    b1 = jnp.concatenate([b1a, b1b], axis=1).astype(jnp.float32)  # (1, 512)

    # Layer 2: per branch, bf16 weights, f32 bias.
    w2q1 = w2a.astype(jnp.bfloat16)
    w2q2 = w2b.astype(jnp.bfloat16)

    # Layer 3: pad each (256, 1) weight into a narrow (256, 8) block
    # (branch-a output -> column 0, branch-b output -> column 1).
    w3q1 = jnp.zeros((HIDDEN, OUT_COLS), jnp.float32).at[:, 0:1].set(w3a)
    w3q2 = jnp.zeros((HIDDEN, OUT_COLS), jnp.float32).at[:, 1:2].set(w3b)
    w3q1 = w3q1.astype(jnp.bfloat16)
    w3q2 = w3q2.astype(jnp.bfloat16)
    b3 = (jnp.zeros((1, OUT_COLS), jnp.float32)
          .at[:, 0:1].set(b3a).at[:, 1:2].set(b3b))

    return (w1_state, w1_action, b1,
            w2q1, b2a.astype(jnp.float32), w2q2, b2b.astype(jnp.float32),
            w3q1, w3q2, b3)


def reference_forward(state_feature, action, params):
    """Pure-JAX reference with the same bf16 operand quantization as the kernel."""
    def q(v):
        return v.astype(jnp.bfloat16).astype(jnp.float32)

    hp = jax.lax.Precision.HIGHEST
    x = jnp.concatenate([state_feature, action], axis=1)
    (w1a, b1a, w2a, b2a, w3a, b3a,
     w1b, b1b, w2b, b2b, w3b, b3b) = params

    def mlp(w1, b1, w2, b2, w3, b3):
        h = jnp.maximum(jnp.dot(q(x), q(w1), precision=hp) + b1, 0.0)
        h = jnp.maximum(jnp.dot(q(h), q(w2), precision=hp) + b2, 0.0)
        return jnp.dot(q(h), q(w3), precision=hp) + b3

    return (mlp(w1a, b1a, w2a, b2a, w3a, b3a),
            mlp(w1b, b1b, w2b, b2b, w3b, b3b))


if __name__ == "__main__":
    key = jax.random.PRNGKey(0)
    k_params, k_state, k_action = jax.random.split(key, 3)

    params = init_params(k_params)
    packed = pack_params(params)

    # Primary small-shape check (B = 8), matching the module's demo regime.
    state_feature = jax.random.normal(k_state, (BATCH, LSTM_UNIT_SIZE), jnp.float32)
    action = jax.random.normal(k_action, (BATCH, ACTION_DIM), jnp.float32)

    q1, q2 = one_double_q_forward(state_feature, action, packed)
    jax.block_until_ready((q1, q2))

    r1, r2 = reference_forward(state_feature, action, params)
    assert q1.shape == (BATCH, 1) and q2.shape == (BATCH, 1)
    assert jnp.allclose(q1, r1, atol=1e-2, rtol=1e-2), (q1, r1)
    assert jnp.allclose(q2, r2, atol=1e-2, rtol=1e-2), (q2, r2)

    # Remainder-block check (B not a multiple of the 256-row tile) to lock in
    # the block-padding behavior of the multi-step grid path.
    B2 = 300
    sf2 = jax.random.normal(jax.random.PRNGKey(1), (B2, LSTM_UNIT_SIZE), jnp.float32)
    ac2 = jax.random.normal(jax.random.PRNGKey(2), (B2, ACTION_DIM), jnp.float32)
    p1, p2 = one_double_q_forward(sf2, ac2, packed)
    jax.block_until_ready((p1, p2))
    s1, s2 = reference_forward(sf2, ac2, params)
    assert p1.shape == (B2, 1) and p2.shape == (B2, 1)
    assert jnp.allclose(p1, s1, atol=1e-2, rtol=1e-2)
    assert jnp.allclose(p2, s2, atol=1e-2, rtol=1e-2)

    print("KERNEL_OK")
</pallas_src>

<mosaic_0001>
module attributes {stable_mosaic.version = 11 : i64} {
  func.func @_double_q_kernel(%arg0: i32, %arg1: memref<8x32xbf16, #tpu.memory_space<vmem>>, %arg2: memref<8x32xbf16, #tpu.memory_space<vmem>>, %arg3: memref<32x512xbf16, #tpu.memory_space<vmem>>, %arg4: memref<32x512xbf16, #tpu.memory_space<vmem>>, %arg5: memref<1x512xf32, #tpu.memory_space<vmem>>, %arg6: memref<256x256xbf16, #tpu.memory_space<vmem>>, %arg7: memref<1x256xf32, #tpu.memory_space<vmem>>, %arg8: memref<256x256xbf16, #tpu.memory_space<vmem>>, %arg9: memref<1x256xf32, #tpu.memory_space<vmem>>, %arg10: memref<256x8xbf16, #tpu.memory_space<vmem>>, %arg11: memref<256x8xbf16, #tpu.memory_space<vmem>>, %arg12: memref<1x8xf32, #tpu.memory_space<vmem>>, %arg13: memref<8x8xf32, #tpu.memory_space<vmem>>) attributes {dimension_semantics = [#tpu.dimension_semantics<parallel>], iteration_bounds = array<i64: 1>, scalar_prefetch = 0 : i64, scratch_operands = 0 : i64, tpu.core_type = #tpu.core_type<tc>, window_params = [{transform_indices = @transform_0, window_bounds = array<i64: 8, 32>}, {transform_indices = @transform_1, window_bounds = array<i64: 8, 32>}, {pipeline_mode = #tpu.pipeline_mode<synchronous>, transform_indices = @transform_2, window_bounds = array<i64: 32, 512>}, {pipeline_mode = #tpu.pipeline_mode<synchronous>, transform_indices = @transform_3, window_bounds = array<i64: 32, 512>}, {pipeline_mode = #tpu.pipeline_mode<synchronous>, transform_indices = @transform_4, window_bounds = array<i64: 1, 512>}, {pipeline_mode = #tpu.pipeline_mode<synchronous>, transform_indices = @transform_5, window_bounds = array<i64: 256, 256>}, {pipeline_mode = #tpu.pipeline_mode<synchronous>, transform_indices = @transform_6, window_bounds = array<i64: 1, 256>}, {pipeline_mode = #tpu.pipeline_mode<synchronous>, transform_indices = @transform_7, window_bounds = array<i64: 256, 256>}, {pipeline_mode = #tpu.pipeline_mode<synchronous>, transform_indices = @transform_8, window_bounds = array<i64: 1, 256>}, {pipeline_mode = #tpu.pipeline_mode<synchronous>, transform_indices = @transform_9, window_bounds = array<i64: 256, 8>}, {pipeline_mode = #tpu.pipeline_mode<synchronous>, transform_indices = @transform_10, window_bounds = array<i64: 256, 8>}, {pipeline_mode = #tpu.pipeline_mode<synchronous>, transform_indices = @transform_11, window_bounds = array<i64: 1, 8>}, {transform_indices = @transform_12, window_bounds = array<i64: 8, 8>}]} {
    %c0 = arith.constant 0 : index
    %c0_0 = arith.constant 0 : index
    %0 = vector.load %arg1[%c0, %c0_0] : memref<8x32xbf16, #tpu.memory_space<vmem>>, vector<8x32xbf16>
    %c0_1 = arith.constant 0 : index
    %c0_2 = arith.constant 0 : index
    %1 = vector.load %arg2[%c0_1, %c0_2] : memref<8x32xbf16, #tpu.memory_space<vmem>>, vector<8x32xbf16>
    %c0_3 = arith.constant 0 : index
    %c0_4 = arith.constant 0 : index
    %2 = vector.load %arg3[%c0_3, %c0_4] : memref<32x512xbf16, #tpu.memory_space<vmem>>, vector<32x512xbf16>
    %cst = arith.constant dense<0.000000e+00> : vector<8x512xf32>
    %3 = tpu.matmul %0, %2, %cst {dimension_numbers = #tpu.dot_dimension_numbers<[1], [0], [0], [1], [0, 0, 1, 1], [], []>} : vector<8x32xbf16>, vector<32x512xbf16>, vector<8x512xf32> -> vector<8x512xf32>
    %c0_5 = arith.constant 0 : index
    %c0_6 = arith.constant 0 : index
    %4 = vector.load %arg4[%c0_5, %c0_6] : memref<32x512xbf16, #tpu.memory_space<vmem>>, vector<32x512xbf16>
    %cst_7 = arith.constant dense<0.000000e+00> : vector<8x512xf32>
    %5 = tpu.matmul %1, %4, %cst_7 {dimension_numbers = #tpu.dot_dimension_numbers<[1], [0], [0], [1], [0, 0, 1, 1], [], []>} : vector<8x32xbf16>, vector<32x512xbf16>, vector<8x512xf32> -> vector<8x512xf32>
    %6 = arith.addf %3, %5 : vector<8x512xf32>
    %c0_8 = arith.constant 0 : index
    %c0_9 = arith.constant 0 : index
    %7 = vector.load %arg5[%c0_8, %c0_9] : memref<1x512xf32, #tpu.memory_space<vmem>>, vector<1x512xf32>
    %8 = vector.broadcast %7 : vector<1x512xf32> to vector<8x512xf32>
    %9 = arith.addf %6, %8 : vector<8x512xf32>
    %cst_10 = arith.constant 0.000000e+00 : f32
    %10 = vector.broadcast %cst_10 : f32 to vector<8x512xf32>
    %11 = arith.maximumf %9, %10 : vector<8x512xf32>
    %12 = arith.truncf %11 : vector<8x512xf32> to vector<8x512xbf16>
    %13 = vector.extract_strided_slice %12 {offsets = [0, 0], sizes = [8, 256], strides = [1, 1]} : vector<8x512xbf16> to vector<8x256xbf16>
    %14 = vector.extract_strided_slice %12 {offsets = [0, 256], sizes = [8, 256], strides = [1, 1]} : vector<8x512xbf16> to vector<8x256xbf16>
    %c0_11 = arith.constant 0 : index
    %c0_12 = arith.constant 0 : index
    %15 = vector.load %arg6[%c0_11, %c0_12] : memref<256x256xbf16, #tpu.memory_space<vmem>>, vector<256x256xbf16>
    %cst_13 = arith.constant dense<0.000000e+00> : vector<8x256xf32>
    %16 = tpu.matmul %13, %15, %cst_13 {dimension_numbers = #tpu.dot_dimension_numbers<[1], [0], [0], [1], [0, 0, 1, 1], [], []>} : vector<8x256xbf16>, vector<256x256xbf16>, vector<8x256xf32> -> vector<8x256xf32>
    %c0_14 = arith.constant 0 : index
    %c0_15 = arith.constant 0 : index
    %17 = vector.load %arg7[%c0_14, %c0_15] : memref<1x256xf32, #tpu.memory_space<vmem>>, vector<1x256xf32>
    %18 = vector.broadcast %17 : vector<1x256xf32> to vector<8x256xf32>
    %19 = arith.addf %16, %18 : vector<8x256xf32>
    %cst_16 = arith.constant 0.000000e+00 : f32
    %20 = vector.broadcast %cst_16 : f32 to vector<8x256xf32>
    %21 = arith.maximumf %19, %20 : vector<8x256xf32>
    %22 = arith.truncf %21 : vector<8x256xf32> to vector<8x256xbf16>
    %c0_17 = arith.constant 0 : index
    %c0_18 = arith.constant 0 : index
    %23 = vector.load %arg8[%c0_17, %c0_18] : memref<256x256xbf16, #tpu.memory_space<vmem>>, vector<256x256xbf16>
    %cst_19 = arith.constant dense<0.000000e+00> : vector<8x256xf32>
    %24 = tpu.matmul %14, %23, %cst_19 {dimension_numbers = #tpu.dot_dimension_numbers<[1], [0], [0], [1], [0, 0, 1, 1], [], []>} : vector<8x256xbf16>, vector<256x256xbf16>, vector<8x256xf32> -> vector<8x256xf32>
    %c0_20 = arith.constant 0 : index
    %c0_21 = arith.constant 0 : index
    %25 = vector.load %arg9[%c0_20, %c0_21] : memref<1x256xf32, #tpu.memory_space<vmem>>, vector<1x256xf32>
    %26 = vector.broadcast %25 : vector<1x256xf32> to vector<8x256xf32>
    %27 = arith.addf %24, %26 : vector<8x256xf32>
    %cst_22 = arith.constant 0.000000e+00 : f32
    %28 = vector.broadcast %cst_22 : f32 to vector<8x256xf32>
    %29 = arith.maximumf %27, %28 : vector<8x256xf32>
    %30 = arith.truncf %29 : vector<8x256xf32> to vector<8x256xbf16>
    %c0_23 = arith.constant 0 : index
    %c0_24 = arith.constant 0 : index
    %31 = vector.load %arg10[%c0_23, %c0_24] : memref<256x8xbf16, #tpu.memory_space<vmem>>, vector<256x8xbf16>
    %cst_25 = arith.constant dense<0.000000e+00> : vector<8x8xf32>
    %32 = tpu.matmul %22, %31, %cst_25 {dimension_numbers = #tpu.dot_dimension_numbers<[1], [0], [0], [1], [0, 0, 1, 1], [], []>} : vector<8x256xbf16>, vector<256x8xbf16>, vector<8x8xf32> -> vector<8x8xf32>
    %c0_26 = arith.constant 0 : index
    %c0_27 = arith.constant 0 : index
    %33 = vector.load %arg11[%c0_26, %c0_27] : memref<256x8xbf16, #tpu.memory_space<vmem>>, vector<256x8xbf16>
    %cst_28 = arith.constant dense<0.000000e+00> : vector<8x8xf32>
    %34 = tpu.matmul %30, %33, %cst_28 {dimension_numbers = #tpu.dot_dimension_numbers<[1], [0], [0], [1], [0, 0, 1, 1], [], []>} : vector<8x256xbf16>, vector<256x8xbf16>, vector<8x8xf32> -> vector<8x8xf32>
    %35 = arith.addf %32, %34 : vector<8x8xf32>
    %c0_29 = arith.constant 0 : index
    %c0_30 = arith.constant 0 : index
    %36 = vector.load %arg12[%c0_29, %c0_30] : memref<1x8xf32, #tpu.memory_space<vmem>>, vector<1x8xf32>
    %37 = vector.broadcast %36 : vector<1x8xf32> to vector<8x8xf32>
    %38 = arith.addf %35, %37 : vector<8x8xf32>
    %c0_31 = arith.constant 0 : index
    %c0_32 = arith.constant 0 : index
    %39 = vector.load %arg13[%c0_31, %c0_32] : memref<8x8xf32, #tpu.memory_space<vmem>>, vector<8x8xf32>
    tpu.vector_store %arg13[%c0_31, %c0_32], %38 {strides = array<i32>} : memref<8x8xf32, #tpu.memory_space<vmem>>, vector<8x8xf32>,
    return
  }
  func.func @transform_0(%arg0: i32) -> (i32, i32) {
    %c0_i32 = arith.constant 0 : i32
    %c0_i32_0 = arith.constant 0 : i32
    return %arg0, %c0_i32 : i32, i32
  }
  func.func @transform_1(%arg0: i32) -> (i32, i32) {
    %c0_i32 = arith.constant 0 : i32
    %c0_i32_0 = arith.constant 0 : i32
    return %arg0, %c0_i32 : i32, i32
  }
  func.func @transform_2(%arg0: i32) -> (i32, i32) {
    %c0_i32 = arith.constant 0 : i32
    %c0_i32_0 = arith.constant 0 : i32
    %c0_i32_1 = arith.constant 0 : i32
    return %c0_i32, %c0_i32_0 : i32, i32
  }
  func.func @transform_3(%arg0: i32) -> (i32, i32) {
    %c0_i32 = arith.constant 0 : i32
    %c0_i32_0 = arith.constant 0 : i32
    %c0_i32_1 = arith.constant 0 : i32
    return %c0_i32, %c0_i32_0 : i32, i32
  }
  func.func @transform_4(%arg0: i32) -> (i32, i32) {
    %c0_i32 = arith.constant 0 : i32
    %c0_i32_0 = arith.constant 0 : i32
    %c0_i32_1 = arith.constant 0 : i32
    return %c0_i32, %c0_i32_0 : i32, i32
  }
  func.func @transform_5(%arg0: i32) -> (i32, i32) {
    %c0_i32 = arith.constant 0 : i32
    %c0_i32_0 = arith.constant 0 : i32
    %c0_i32_1 = arith.constant 0 : i32
    return %c0_i32, %c0_i32_0 : i32, i32
  }
  func.func @transform_6(%arg0: i32) -> (i32, i32) {
    %c0_i32 = arith.constant 0 : i32
    %c0_i32_0 = arith.constant 0 : i32
    %c0_i32_1 = arith.constant 0 : i32
    return %c0_i32, %c0_i32_0 : i32, i32
  }
  func.func @transform_7(%arg0: i32) -> (i32, i32) {
    %c0_i32 = arith.constant 0 : i32
    %c0_i32_0 = arith.constant 0 : i32
    %c0_i32_1 = arith.constant 0 : i32
    return %c0_i32, %c0_i32_0 : i32, i32
  }
  func.func @transform_8(%arg0: i32) -> (i32, i32) {
    %c0_i32 = arith.constant 0 : i32
    %c0_i32_0 = arith.constant 0 : i32
    %c0_i32_1 = arith.constant 0 : i32
    return %c0_i32, %c0_i32_0 : i32, i32
  }
  func.func @transform_9(%arg0: i32) -> (i32, i32) {
    %c0_i32 = arith.constant 0 : i32
    %c0_i32_0 = arith.constant 0 : i32
    %c0_i32_1 = arith.constant 0 : i32
    return %c0_i32, %c0_i32_0 : i32, i32
  }
  func.func @transform_10(%arg0: i32) -> (i32, i32) {
    %c0_i32 = arith.constant 0 : i32
    %c0_i32_0 = arith.constant 0 : i32
    %c0_i32_1 = arith.constant 0 : i32
    return %c0_i32, %c0_i32_0 : i32, i32
  }
  func.func @transform_11(%arg0: i32) -> (i32, i32) {
    %c0_i32 = arith.constant 0 : i32
    %c0_i32_0 = arith.constant 0 : i32
    %c0_i32_1 = arith.constant 0 : i32
    return %c0_i32, %c0_i32_0 : i32, i32
  }
  func.func @transform_12(%arg0: i32) -> (i32, i32) {
    %c0_i32 = arith.constant 0 : i32
    %c0_i32_0 = arith.constant 0 : i32
    return %arg0, %c0_i32 : i32, i32
  }
}

</mosaic_0001>

<bundles_post_ra>
// kernel: _forward_impl.1
= control target key start
LH: loop header
LB: loop body
LE: loop exit
PB: predicated region body
PF: predicated region fallthrough
CT: control target
= control target key end

     0   :  { %17 = vsyncpa [#allocation3], 0  ;;  %s2217_s0 = inlined_call_operand.vmem [shape: bf16[8,32], index: 0, kind: input, shape index: {}]   ;;  %s2218_s1 = inlined_call_operand.vmem [shape: bf16[8,32], index: 1, kind: input, shape index: {}]   ;;  %s2219_s2 = inlined_call_operand.hbm [shape: bf16[32,512], index: 2, kind: input, shape index: {}]   ;;  %s2220_s3 = inlined_call_operand.hbm [shape: bf16[32,512], index: 3, kind: input, shape index: {}]   ;;  %s2221_s4 = inlined_call_operand.vmem [shape: f32[1,512], index: 4, kind: input, shape index: {}]   ;;  %s2222_s5 = inlined_call_operand.vmem [shape: bf16[256,256], index: 5, kind: input, shape index: {}]   ;;  %s2223_s6 = inlined_call_operand.vmem [shape: f32[1,256], index: 6, kind: input, shape index: {}]   ;;  %s2224_s7 = inlined_call_operand.hbm [shape: bf16[256,256], index: 7, kind: input, shape index: {}]   ;;  %s2225_s8 = inlined_call_operand.vmem [shape: f32[1,256], index: 8, kind: input, shape index: {}]   ;;  %s2226_s9 = inlined_call_operand.vmem [shape: bf16[256,8], index: 9, kind: input, shape index: {}]   ;;  %s2227_s10 = inlined_call_operand.vmem [shape: bf16[256,8], index: 10, kind: input, shape index: {}]   ;;  %s2228_s11 = inlined_call_operand.vmem [shape: f32[1,8], index: 11, kind: input, shape index: {}]   ;;  %s2229_s12 = inlined_call_operand.vmem [shape: f32[8,8], index: 12, kind: output, shape index: {}]  }
   0x1   :  { %18 = vsyncpa [#allocation5], 0  ;;  %s40_s23 = sshll.u32 %s2220_s3, 4  ;;  %s1813_s24 = smov [#allocation4]   ;;  %s41_s23 = int_to_ptr.hbm [resolvable:$true] %s40_s23 }
   0x2   :  { %s42_s25 = sshll.u32 %s1813_s24, 4  ;;  %s27_s28 = sshll.u32 %s2219_s2, 4  ;;  %s43_s25 = int_to_ptr.vmem [resolvable:$true] %s42_s25  ;;  %s28_s28 = int_to_ptr.hbm [resolvable:$true] %s27_s28 }
   0x3   :  { %s1814_s29 = smov 256   ;;  %s1815_s30 = smov 16  }
   0x4   :  { %48 = dma.hbm_to_vmem [thread:$0]  %s41_s23, 1024, %s43_s25, [#allocation5], %s1814_s29, %s1814_s29, %s1815_s30  }
   0x5   :  { %s1816_s13 = smov [#allocation2]   ;;  %s59_s17 = sshll.u32 %s2224_s7, 4  ;;  %s60_s17 = int_to_ptr.hbm [resolvable:$true] %s59_s17 }
   0x6   :  { %s29_s14 = sshll.u32 %s1816_s13, 4  ;;  %s1817_s3 = smov [#allocation6]   ;;  %s30_s14 = int_to_ptr.vmem [resolvable:$true] %s29_s14 }
   0x7   :  { %35 = dma.hbm_to_vmem [thread:$0]  %s28_s28, 1024, %s30_s14, [#allocation3], %s1814_s29, %s1814_s29, %s1815_s30  }
   0x8   :  { %s61_s18 = sshll.u32 %s1817_s3, 4  ;;  %s1818_s19 = smov 128   ;;  %s62_s18 = int_to_ptr.vmem [resolvable:$true] %s61_s18 }
   0x9   :  { %s1819_s20 = smov 8  }
   0xa   :  { %67 = dma.hbm_to_vmem [thread:$0]  %s60_s17, 4096, %s62_s18, [#allocation5], %s1818_s19, %s1818_s19, %s1819_s20  }
   0xb   :  { %1809 = dma.done.wait [#allocation3], 1024  }
   0xc   :  { %1810 = vsyncadd [#allocation3], 4294966272 }
   0xd   :  { %1811 = dma.done.wait [#allocation5], 5120  }
   0xe   :  { %1812 = vsyncadd [#allocation5], 4294962176  ;;  %vm147_vm0 = vcmask 261120   ;;  %v1179_v0 = vld [vmem:[#allocation4 + $0x20] sm:$0xf]  ;;  %vm1153_vm1 = vcmask 64512  }
   0xf   :  { %v1631_v1 = vld [vmem:[#allocation4 + $0x2c] sm:$0xf0]  ;;  %v1629_v2 = vld [vmem:[#allocation4 + $0x24] sm:$0xf]  ;;  %v1181_v4 = vld [vmem:[#allocation4 + $0x30] sm:$0xf0] }
  0x10   :  { %v1180_v3 = vor.u32 %v1631_v1, %v1179_v0  ;;  %v1187_v5 = vld [vmem:[#allocation4 + $0x28] sm:$0xf]  ;;  %v1632_v6 = vld [vmem:[#allocation4 + $0x34] sm:$0xf0]  ;;  %v1184_v7 = vor.u32 %v1629_v2, %v1181_v4  ;;  %v1630_v9 = vld [vmem:[#allocation4 + $0x2c] sm:$0xf] }
  0x11   :  { %v1188_v8 = vor.u32 %v1632_v6, %v1187_v5  ;;  %v1189_v10 = vld [vmem:[#allocation4 + $0x38] sm:$0xf0]  ;;  %v1163_v11 = vld [vmem:[#allocation4] sm:$0xf]  ;;  %v1627_v13 = vld [vmem:[#allocation4 + $0xc] sm:$0xf0] }
  0x12   :  { %157 = vmatpush.bf16.msra.mxu0 %v1180_v3  ;;  %v1192_v12 = vor.u32 %v1630_v9, %v1189_v10  ;;  %v1625_v14 = vld [vmem:[#allocation4 + $0x4] sm:$0xf]  ;;  %v1165_v15 = vld [vmem:[#allocation4 + $0x10] sm:$0xf0]  ;;  %170 = vmatpush.bf16.msra.mxu1 %v1184_v7  ;;  %v1164_v16 = vor.u32 %v1627_v13, %v1163_v11  ;;  %v1171_v18 = vld [vmem:[#allocation4 + $0x8] sm:$0xf] }
  0x13   :  { %183 = vmatpush.bf16.msra.mxu2 %v1188_v8  ;;  %v1168_v17 = vor.u32 %v1625_v14, %v1165_v15  ;;  %v1628_v19 = vld [vmem:[#allocation4 + $0x14] sm:$0xf0]  ;;  %v1626_v20 = vld [vmem:[#allocation4 + $0xc] sm:$0xf]  ;;  %v1173_v22 = vld [vmem:[#allocation4 + $0x18] sm:$0xf0] }
  0x14   :  { %196 = vmatpush.bf16.msra.mxu3 %v1192_v12  ;;  %v1172_v21 = vor.u32 %v1628_v19, %v1171_v18  ;;  %v90_v23 = vld [vmem:[%s2218_s1] sm:$0xf]  ;;  %v1176_v25 = vor.u32 %v1626_v20, %v1173_v22  ;;  %v1623_v26 = vld [vmem:[#allocation2 + $0x2c] sm:$0xf0]  ;;  %v1621_v27 = vld [vmem:[#allocation2 + $0x24] sm:$0xf] }
  0x15   :  { %v1215_v24 = vld [vmem:[#allocation2 + $0x20] sm:$0xf]  ;;  %v1217_v28 = vld [vmem:[#allocation2 + $0x30] sm:$0xf0]  ;;  %v1619_v32 = vld [vmem:[#allocation2 + $0xc] sm:$0xf0] }
  0x16   :  { %158 = vmatpush.bf16.msra.mxu0 %v1164_v16  ;;  %v1216_v29 = vor.u32 %v1623_v26, %v1215_v24  ;;  %v1220_v30 = vor.u32 %v1621_v27, %v1217_v28  ;;  %v1199_v31 = vld [vmem:[#allocation2] sm:$0xf]  ;;  %v1617_v33 = vld [vmem:[#allocation2 + $0x4] sm:$0xf]  ;;  %171 = vmatpush.bf16.msra.mxu1 %v1168_v17  ;;  %v1201_v34 = vld [vmem:[#allocation2 + $0x10] sm:$0xf0] }
  0x17   :  { %184 = vmatpush.bf16.msra.mxu2 %v1172_v21  ;;  %v1223_v35 = vld [vmem:[#allocation2 + $0x28] sm:$0xf]  ;;  %v1624_v36 = vld [vmem:[#allocation2 + $0x34] sm:$0xf0]  ;;  %v1200_v37 = vor.u32 %v1619_v32, %v1199_v31  ;;  %v1622_v39 = vld [vmem:[#allocation2 + $0x2c] sm:$0xf]  ;;  %v1204_v42 = vor.u32 %v1617_v33, %v1201_v34 }
  0x18   :  { %197 = vmatpush.bf16.msra.mxu3 %v1176_v25  ;;  %v1224_v38 = vor.u32 %v1624_v36, %v1223_v35  ;;  %v1225_v40 = vld [vmem:[#allocation2 + $0x38] sm:$0xf0]  ;;  %v1207_v41 = vld [vmem:[#allocation2 + $0x8] sm:$0xf]  ;;  %v1620_v44 = vld [vmem:[#allocation2 + $0x14] sm:$0xf0] }
  0x19   :  { %1193 = vmatmul.msk.bf16.vlgmr.msra.gmra.mxu0 %vm147_vm0, %v90_v23  ;;  %v1228_v43 = vor.u32 %v1622_v39, %v1225_v40  ;;  %v1618_v45 = vld [vmem:[#allocation2 + $0xc] sm:$0xf]  ;;  %v1209_v46 = vld [vmem:[#allocation2 + $0x18] sm:$0xf0]  ;;  %1194 = vmatmul.msk.bf16.vlgmr.msra.gmra.mxu1 %vm147_vm0, %v90_v23  ;;  %v1291_v47 = vld [vmem:[%s2222_s5 + $0x70] sm:$0xf]  ;;  %v1208_v49 = vor.u32 %v1620_v44, %v1207_v41 }
  0x1a   :  { %252 = vmatpush.bf16.msrb.mxu0 %v1216_v29  ;;  %265 = vmatpush.bf16.msrb.mxu1 %v1220_v30  ;;  %v1648_v48 = vld [vmem:[%s2222_s5 + $0x74] sm:$0xf0]  ;;  %v1355_v51 = vld [vmem:[%s2222_s5 + $0xf0] sm:$0xf]  ;;  %v1647_v53 = vld [vmem:[%s2222_s5 + $0x74] sm:$0xf]  ;;  %v1212_v54 = vor.u32 %v1618_v45, %v1209_v46 }
  0x1b   :  { %1195 = vmatmul.msk.bf16.vlgmr.msra.gmra.mxu2 %vm147_vm0, %v90_v23  ;;  %1196 = vmatmul.msk.bf16.vlgmr.msra.gmra.mxu3 %vm147_vm0, %v90_v23  ;;  %v1292_v50 = vor.u32 %v1648_v48, %v1291_v47  ;;  %v1664_v52 = vld [vmem:[%s2222_s5 + $0xf4] sm:$0xf0]  ;;  %v1293_v56 = vld [vmem:[%s2222_s5 + $0x78] sm:$0xf0]  ;;  %v1663_v57 = vld [vmem:[%s2222_s5 + $0xf4] sm:$0xf] }
  0x1c   :  { %278 = vmatpush.bf16.msrb.mxu2 %v1224_v38  ;;  %291 = vmatpush.bf16.msrb.mxu3 %v1228_v43  ;;  %v1356_v55 = vor.u32 %v1664_v52, %v1355_v51  ;;  %v1357_v58 = vld [vmem:[%s2222_s5 + $0xf8] sm:$0xf0]  ;;  %v1296_v59 = vor.u32 %v1647_v53, %v1293_v56  ;;  %v1283_v61 = vld [vmem:[%s2222_s5 + $0x60] sm:$0xf]  ;;  %v1646_v62 = vld [vmem:[%s2222_s5 + $0x64] sm:$0xf0] }
  0x1d   :  { %v1360_v60 = vor.u32 %v1663_v57, %v1357_v58  ;;  %v1347_v63 = vld [vmem:[%s2222_s5 + $0xe0] sm:$0xf]  ;;  %v1284_v0 = vor.u32 %v1646_v62, %v1283_v61  ;;  %v1662_v1 = vld [vmem:[%s2222_s5 + $0xe4] sm:$0xf0]  ;;  %v1645_v2 = vld [vmem:[%s2222_s5 + $0x64] sm:$0xf] }
  0x1e   :  { %253 = vmatpush.bf16.msrb.mxu0 %v1200_v37  ;;  %266 = vmatpush.bf16.msrb.mxu1 %v1204_v42  ;;  %v1285_v3 = vld [vmem:[%s2222_s5 + $0x68] sm:$0xf0]  ;;  %v1348_v4 = vor.u32 %v1662_v1, %v1347_v63  ;;  %v1661_v5 = vld [vmem:[%s2222_s5 + $0xe4] sm:$0xf]  ;;  %v1275_v7 = vld [vmem:[%s2222_s5 + $0x50] sm:$0xf] }
  0x1f   :  { %v1349_v6 = vld [vmem:[%s2222_s5 + $0xe8] sm:$0xf0]  ;;  %v1288_v8 = vor.u32 %v1645_v2, %v1285_v3  ;;  %v1644_v9 = vld [vmem:[%s2222_s5 + $0x54] sm:$0xf0]  ;;  %v1339_v10 = vld [vmem:[%s2222_s5 + $0xd0] sm:$0xf] }
  0x20   :  { %279 = vmatpush.bf16.msrb.mxu2 %v1208_v49  ;;  %292 = vmatpush.bf16.msrb.mxu3 %v1212_v54  ;;  %v1660_v11 = vld [vmem:[%s2222_s5 + $0xd4] sm:$0xf0]  ;;  %v1352_v12 = vor.u32 %v1661_v5, %v1349_v6  ;;  %v1276_v13 = vor.u32 %v1644_v9, %v1275_v7  ;;  %v1643_v14 = vld [vmem:[%s2222_s5 + $0x54] sm:$0xf]  ;;  %v1277_v15 = vld [vmem:[%s2222_s5 + $0x58] sm:$0xf0] }
  0x21   :  { %v1340_v16 = vor.u32 %v1660_v11, %v1339_v10  ;;  %v1659_v17 = vld [vmem:[%s2222_s5 + $0xd4] sm:$0xf]  ;;  %v1341_v18 = vld [vmem:[%s2222_s5 + $0xd8] sm:$0xf0]  ;;  %v1267_v19 = vld [vmem:[%s2222_s5 + $0x40] sm:$0xf]  ;;  %v1280_v20 = vor.u32 %v1643_v14, %v1277_v15 }
  0x22   :  { %523 = vmatpush.bf16.msra.mxu0 %v1292_v50  ;;  %536 = vmatpush.bf16.msra.mxu1 %v1356_v55  ;;  %v1642_v21 = vld [vmem:[%s2222_s5 + $0x44] sm:$0xf0]  ;;  %v1331_v22 = vld [vmem:[%s2222_s5 + $0xc0] sm:$0xf]  ;;  %v1344_v24 = vor.u32 %v1659_v17, %v1341_v18  ;;  %v1641_v25 = vld [vmem:[%s2222_s5 + $0x44] sm:$0xf] }
  0x23   :  { %v1658_v23 = vld [vmem:[%s2222_s5 + $0xc4] sm:$0xf0]  ;;  %v1269_v26 = vld [vmem:[%s2222_s5 + $0x48] sm:$0xf0]  ;;  %v89_v27 = vld [vmem:[%s2217_s0] sm:$0xf]  ;;  %v1268_v30 = vor.u32 %v1642_v21, %v1267_v19 }
  0x24   :  { %549 = vmatpush.bf16.msra.mxu2 %v1296_v59  ;;  %562 = vmatpush.bf16.msra.mxu3 %v1360_v60  ;;  %v1657_v28 = vld [vmem:[%s2222_s5 + $0xc4] sm:$0xf]  ;;  %v1333_v29 = vld [vmem:[%s2222_s5 + $0xc8] sm:$0xf0]  ;;  %v1332_v31 = vor.u32 %v1658_v23, %v1331_v22  ;;  %v1272_v32 = vor.u32 %v1641_v25, %v1269_v26  ;;  %v1259_v34 = vld [vmem:[%s2222_s5 + $0x30] sm:$0xf] }
  0x25   :  { %v1336_v33 = vor.u32 %v1657_v28, %v1333_v29  ;;  %v1640_v35 = vld [vmem:[%s2222_s5 + $0x34] sm:$0xf0]  ;;  %v1323_v36 = vld [vmem:[%s2222_s5 + $0xb0] sm:$0xf]  ;;  %v1639_v39 = vld [vmem:[%s2222_s5 + $0x34] sm:$0xf] }
  0x26   :  { %524 = vmatpush.bf16.msra.mxu0 %v1284_v0  ;;  %537 = vmatpush.bf16.msra.mxu1 %v1348_v4  ;;  %v1260_v37 = vor.u32 %v1640_v35, %v1259_v34  ;;  %v1656_v38 = vld [vmem:[%s2222_s5 + $0xb4] sm:$0xf0]  ;;  %v1261_v40 = vld [vmem:[%s2222_s5 + $0x38] sm:$0xf0]  ;;  %v1655_v43 = vld [vmem:[%s2222_s5 + $0xb4] sm:$0xf] }
  0x27   :  { %v1324_v41 = vor.u32 %v1656_v38, %v1323_v36  ;;  %v1264_v42 = vor.u32 %v1639_v39, %v1261_v40  ;;  %v1325_v44 = vld [vmem:[%s2222_s5 + $0xb8] sm:$0xf0]  ;;  %v1251_v45 = vld [vmem:[%s2222_s5 + $0x20] sm:$0xf]  ;;  %v1638_v47 = vld [vmem:[%s2222_s5 + $0x24] sm:$0xf0] }
  0x28   :  { %550 = vmatpush.bf16.msra.mxu2 %v1288_v8  ;;  %563 = vmatpush.bf16.msra.mxu3 %v1352_v12  ;;  %v1328_v46 = vor.u32 %v1655_v43, %v1325_v44  ;;  %v1315_v48 = vld [vmem:[%s2222_s5 + $0xa0] sm:$0xf]  ;;  %v1654_v49 = vld [vmem:[%s2222_s5 + $0xa4] sm:$0xf0]  ;;  %v1252_v50 = vor.u32 %v1638_v47, %v1251_v45  ;;  %v1637_v52 = vld [vmem:[%s2222_s5 + $0x24] sm:$0xf] }
  0x29   :  { %1229 = vmatmul.msk.bf16.vlgmr.msrb.gmra.mxu0 %vm147_vm0, %v89_v27  ;;  %1230 = vmatmul.msk.bf16.vlgmr.msrb.gmra.mxu1 %vm147_vm0, %v89_v27  ;;  %v1316_v51 = vor.u32 %v1654_v49, %v1315_v48  ;;  %v1253_v53 = vld [vmem:[%s2222_s5 + $0x28] sm:$0xf0]  ;;  %v1653_v54 = vld [vmem:[%s2222_s5 + $0xa4] sm:$0xf]  ;;  %v1243_v58 = vld [vmem:[%s2222_s5 + $0x10] sm:$0xf] }
  0x2a   :  { %525 = vmatpush.bf16.msra.mxu0 %v1276_v13  ;;  %538 = vmatpush.bf16.msra.mxu1 %v1340_v16  ;;  %v1256_v55 = vor.u32 %v1637_v52, %v1253_v53  ;;  %v1317_v56 = vld [vmem:[%s2222_s5 + $0xa8] sm:$0xf0]  ;;  %v1636_v59 = vld [vmem:[%s2222_s5 + $0x14] sm:$0xf0]  ;;  %v1307_v60 = vld [vmem:[%s2222_s5 + $0x90] sm:$0xf] }
  0x2b   :  { %1231 = vmatmul.msk.bf16.vlgmr.msrb.gmra.mxu2 %vm147_vm0, %v89_v27  ;;  %1232 = vmatmul.msk.bf16.vlgmr.msrb.gmra.mxu3 %vm147_vm0, %v89_v27  ;;  %v1320_v57 = vor.u32 %v1653_v54, %v1317_v56  ;;  %v1244_v61 = vor.u32 %v1636_v59, %v1243_v58  ;;  %v1652_v62 = vld [vmem:[%s2222_s5 + $0x94] sm:$0xf0]  ;;  %v1635_v63 = vld [vmem:[%s2222_s5 + $0x14] sm:$0xf]  ;;  %v1245_v0 = vld [vmem:[%s2222_s5 + $0x18] sm:$0xf0] }
  0x2c   :  { %551 = vmatpush.bf16.msra.mxu2 %v1280_v20  ;;  %564 = vmatpush.bf16.msra.mxu3 %v1344_v24  ;;  %v1308_v1 = vor.u32 %v1652_v62, %v1307_v60  ;;  %v1248_v2 = vor.u32 %v1635_v63, %v1245_v0  ;;  %v1651_v3 = vld [vmem:[%s2222_s5 + $0x94] sm:$0xf]  ;;  %v1309_v4 = vld [vmem:[%s2222_s5 + $0x98] sm:$0xf0]  ;;  %v1235_v5 = vld [vmem:[%s2222_s5] sm:$0xf] }
  0x2d   :  { %v1312_v6 = vor.u32 %v1651_v3, %v1309_v4  ;;  %v1634_v7 = vld [vmem:[%s2222_s5 + $0x4] sm:$0xf0]  ;;  %v1299_v8 = vld [vmem:[%s2222_s5 + $0x80] sm:$0xf]  ;;  %v1633_v12 = vld [vmem:[%s2222_s5 + $0x4] sm:$0xf] }
  0x2e   :  { %526 = vmatpush.bf16.msra.mxu0 %v1268_v30  ;;  %539 = vmatpush.bf16.msra.mxu1 %v1332_v31  ;;  %v1650_v9 = vld [vmem:[%s2222_s5 + $0x84] sm:$0xf0]  ;;  %v1236_v10 = vor.u32 %v1634_v7, %v1235_v5  ;;  %v1237_v13 = vld [vmem:[%s2222_s5 + $0x8] sm:$0xf0]  ;;  %v1649_v14 = vld [vmem:[%s2222_s5 + $0x84] sm:$0xf] }
  0x2f   :  { %v1300_v11 = vor.u32 %v1650_v9, %v1299_v8  ;;  %v1240_v15 = vor.u32 %v1633_v12, %v1237_v13  ;;  %v1301_v16 = vld [vmem:[%s2222_s5 + $0x88] sm:$0xf0]  ;;  %v1419_v17 = vld [vmem:[#allocation6 + $0x70] sm:$0xf]  ;;  %v1680_v18 = vld [vmem:[#allocation6 + $0x74] sm:$0xf0] }
  0x30   :  { %552 = vmatpush.bf16.msra.mxu2 %v1272_v32  ;;  %565 = vmatpush.bf16.msra.mxu3 %v1336_v33  ;;  %v1304_v19 = vor.u32 %v1649_v14, %v1301_v16  ;;  %v1420_v20 = vor.u32 %v1680_v18, %v1419_v17  ;;  %v1483_v21 = vld [vmem:[#allocation6 + $0xf0] sm:$0xf]  ;;  %v1696_v22 = vld [vmem:[#allocation6 + $0xf4] sm:$0xf0]  ;;  %v1679_v23 = vld [vmem:[#allocation6 + $0x74] sm:$0xf] }
  0x31   :  { %v1484_v24 = vor.u32 %v1696_v22, %v1483_v21  ;;  %v1421_v25 = vld [vmem:[#allocation6 + $0x78] sm:$0xf0]  ;;  %v1695_v26 = vld [vmem:[#allocation6 + $0xf4] sm:$0xf]  ;;  %v1411_v30 = vld [vmem:[#allocation6 + $0x60] sm:$0xf] }
  0x32   :  { %527 = vmatpush.bf16.msra.mxu0 %v1260_v37  ;;  %540 = vmatpush.bf16.msra.mxu1 %v1324_v41  ;;  %v1485_v27 = vld [vmem:[#allocation6 + $0xf8] sm:$0xf0]  ;;  %v1424_v28 = vor.u32 %v1679_v23, %v1421_v25  ;;  %v1678_v31 = vld [vmem:[#allocation6 + $0x64] sm:$0xf0]  ;;  %v1475_v33 = vld [vmem:[#allocation6 + $0xe0] sm:$0xf] }
  0x33   :  { %v1488_v29 = vor.u32 %v1695_v26, %v1485_v27  ;;  %v1412_v32 = vor.u32 %v1678_v31, %v1411_v30  ;;  %v1694_v34 = vld [vmem:[#allocation6 + $0xe4] sm:$0xf0]  ;;  %v1677_v36 = vld [vmem:[#allocation6 + $0x64] sm:$0xf]  ;;  %v1413_v37 = vld [vmem:[#allocation6 + $0x68] sm:$0xf0] }
  0x34   :  { %553 = vmatpush.bf16.msra.mxu2 %v1264_v42  ;;  %566 = vmatpush.bf16.msra.mxu3 %v1328_v46  ;;  %v1476_v35 = vor.u32 %v1694_v34, %v1475_v33  ;;  %v1416_v38 = vor.u32 %v1677_v36, %v1413_v37  ;;  %v1693_v39 = vld [vmem:[#allocation6 + $0xe4] sm:$0xf]  ;;  %v1477_v40 = vld [vmem:[#allocation6 + $0xe8] sm:$0xf0]  ;;  %v1403_v42 = vld [vmem:[#allocation6 + $0x50] sm:$0xf] }
  0x35   :  { %v1480_v41 = vor.u32 %v1693_v39, %v1477_v40  ;;  %v1676_v43 = vld [vmem:[#allocation6 + $0x54] sm:$0xf0]  ;;  %v1467_v44 = vld [vmem:[#allocation6 + $0xd0] sm:$0xf]  ;;  %v1675_v47 = vld [vmem:[#allocation6 + $0x54] sm:$0xf] }
  0x36   :  { %528 = vmatpush.bf16.msra.mxu0 %v1252_v50  ;;  %541 = vmatpush.bf16.msra.mxu1 %v1316_v51  ;;  %v1404_v45 = vor.u32 %v1676_v43, %v1403_v42  ;;  %v1692_v46 = vld [vmem:[#allocation6 + $0xd4] sm:$0xf0]  ;;  %v1405_v48 = vld [vmem:[#allocation6 + $0x58] sm:$0xf0]  ;;  %v1691_v51 = vld [vmem:[#allocation6 + $0xd4] sm:$0xf] }
  0x37   :  { %v1468_v49 = vor.u32 %v1692_v46, %v1467_v44  ;;  %v1408_v50 = vor.u32 %v1675_v47, %v1405_v48  ;;  %v1469_v52 = vld [vmem:[#allocation6 + $0xd8] sm:$0xf0]  ;;  %v1395_v54 = vld [vmem:[#allocation6 + $0x40] sm:$0xf]  ;;  %v1690_v58 = vld [vmem:[#allocation6 + $0xc4] sm:$0xf0] }
  0x38   :  { %554 = vmatpush.bf16.msra.mxu2 %v1256_v55  ;;  %567 = vmatpush.bf16.msra.mxu3 %v1320_v57  ;;  %v1472_v53 = vor.u32 %v1691_v51, %v1469_v52  ;;  %v1674_v55 = vld [vmem:[#allocation6 + $0x44] sm:$0xf0]  ;;  %v1459_v57 = vld [vmem:[#allocation6 + $0xc0] sm:$0xf]  ;;  %v1673_v59 = vld [vmem:[#allocation6 + $0x44] sm:$0xf] }
  0x39   :  { %v1396_v56 = vor.u32 %v1674_v55, %v1395_v54  ;;  %v1460_v60 = vor.u32 %v1690_v58, %v1459_v57  ;;  %v1689_v62 = vld [vmem:[#allocation6 + $0xc4] sm:$0xf]  ;;  %v1461_v63 = vld [vmem:[#allocation6 + $0xc8] sm:$0xf0]  ;;  %v1672_v3 = vld [vmem:[#allocation6 + $0x34] sm:$0xf0] }
  0x3a   :  { %529 = vmatpush.bf16.msra.mxu0 %v1244_v61  ;;  %542 = vmatpush.bf16.msra.mxu1 %v1308_v1  ;;  %v1397_v61 = vld [vmem:[#allocation6 + $0x48] sm:$0xf0]  ;;  %v1464_v1 = vor.u32 %v1689_v62, %v1461_v63  ;;  %v1451_v4 = vld [vmem:[#allocation6 + $0xb0] sm:$0xf]  ;;  %v1671_v7 = vld [vmem:[#allocation6 + $0x34] sm:$0xf] }
  0x3b   :  { %v1400_v0 = vor.u32 %v1673_v59, %v1397_v61  ;;  %v1389_v8 = vld [vmem:[#allocation6 + $0x38] sm:$0xf0]  ;;  %v1379_v16 = vld [vmem:[#allocation6 + $0x20] sm:$0xf]  ;;  %v1670_v17 = vld [vmem:[#allocation6 + $0x24] sm:$0xf0] }
  0x3c   :  { %555 = vmatpush.bf16.msra.mxu2 %v1248_v2  ;;  %568 = vmatpush.bf16.msra.mxu3 %v1312_v6  ;;  %v1387_v2 = vld [vmem:[#allocation6 + $0x30] sm:$0xf]  ;;  %v1688_v6 = vld [vmem:[#allocation6 + $0xb4] sm:$0xf0]  ;;  %v1453_v12 = vld [vmem:[#allocation6 + $0xb8] sm:$0xf0] }
  0x3d   :  { %v1388_v5 = vor.u32 %v1672_v3, %v1387_v2  ;;  %v1452_v9 = vor.u32 %v1688_v6, %v1451_v4  ;;  %v1443_v18 = vld [vmem:[#allocation6 + $0xa0] sm:$0xf]  ;;  %v1669_v21 = vld [vmem:[#allocation6 + $0x24] sm:$0xf]  ;;  %v1381_v22 = vld [vmem:[#allocation6 + $0x28] sm:$0xf0] }
  0x3e   :  { %530 = vmatpush.bf16.msra.mxu0 %v1236_v10  ;;  %543 = vmatpush.bf16.msra.mxu1 %v1300_v11  ;;  %v1392_v10 = vor.u32 %v1671_v7, %v1389_v8  ;;  %v1687_v11 = vld [vmem:[#allocation6 + $0xb4] sm:$0xf]  ;;  %v1685_v25 = vld [vmem:[#allocation6 + $0xa4] sm:$0xf]  ;;  %v1445_v26 = vld [vmem:[#allocation6 + $0xa8] sm:$0xf0] }
  0x3f   :  { %v1456_v14 = vor.u32 %v1687_v11, %v1453_v12  ;;  %v1371_v27 = vld [vmem:[#allocation6 + $0x10] sm:$0xf]  ;;  %v1684_v31 = vld [vmem:[#allocation6 + $0x94] sm:$0xf0]  ;;  %v1667_v33 = vld [vmem:[#allocation6 + $0x14] sm:$0xf] }
  0x40   :  { %556 = vmatpush.bf16.msra.mxu2 %v1240_v15  ;;  %569 = vmatpush.bf16.msra.mxu3 %v1304_v19  ;;  %v1380_v19 = vor.u32 %v1670_v17, %v1379_v16  ;;  %v1435_v30 = vld [vmem:[#allocation6 + $0x90] sm:$0xf]  ;;  %v1373_v34 = vld [vmem:[#allocation6 + $0x18] sm:$0xf0]  ;;  %v1363_v39 = vld [vmem:[#allocation6] sm:$0xf] }
  0x41   :  { %v1436_v36 = vor.u32 %v1684_v31, %v1435_v30  ;;  %v1376_v37 = vor.u32 %v1667_v33, %v1373_v34  ;;  %v1666_v40 = vld [vmem:[#allocation6 + $0x4] sm:$0xf0]  ;;  %v1427_v43 = vld [vmem:[#allocation6 + $0x80] sm:$0xf]  ;;  %v1365_v48 = vld [vmem:[#allocation6 + $0x8] sm:$0xf0] }
  0x42   :  { %784 = vmatpush.bf16.msrb.mxu0 %v1420_v20  ;;  %797 = vmatpush.bf16.msrb.mxu1 %v1484_v24  ;;  %v1686_v20 = vld [vmem:[#allocation6 + $0xa4] sm:$0xf0]  ;;  %v1384_v24 = vor.u32 %v1669_v21, %v1381_v22  ;;  %v1364_v52 = vor.u32 %v1666_v40, %v1363_v39  ;;  %v1712_v21 = vld [vmem:[%s2226_s9 + $0x78] sm:$0xff]  ;;  %v1699_v40 = vld [vmem:[%s2226_s9 + $0x10] sm:$0xff] }
  0x43   :  { %v1444_v23 = vor.u32 %v1686_v20, %v1443_v18  ;;  %v1682_v44 = vld [vmem:[#allocation6 + $0x84] sm:$0xf0]  ;;  %v1720_v22 = vld [vmem:[%s2227_s10 + $0x38] sm:$0xff] }
  0x44   :  { %810 = vmatpush.bf16.msrb.mxu2 %v1424_v28  ;;  %823 = vmatpush.bf16.msrb.mxu3 %v1488_v29  ;;  %v1448_v28 = vor.u32 %v1685_v25, %v1445_v26  ;;  %v1668_v29 = vld [vmem:[#allocation6 + $0x14] sm:$0xf0]  ;;  %v1702_v31 = vld [vmem:[%s2226_s9 + $0x28] sm:$0xff] }
  0x45   :  { %v1700_v39 = vld [vmem:[%s2226_s9 + $0x18] sm:$0xff] }
  0x46   :  { %785 = vmatpush.bf16.msrb.mxu0 %v1412_v32  ;;  %798 = vmatpush.bf16.msrb.mxu1 %v1476_v35  ;;  %v1372_v32 = vor.u32 %v1668_v29, %v1371_v27  ;;  %v1683_v35 = vld [vmem:[#allocation6 + $0x94] sm:$0xf] }
  0x47   :  { %v1703_v27 = vld [vmem:[%s2226_s9 + $0x30] sm:$0xff] }
  0x48   :  { %811 = vmatpush.bf16.msrb.mxu2 %v1416_v38  ;;  %824 = vmatpush.bf16.msrb.mxu3 %v1480_v41  ;;  %v1437_v38 = vld [vmem:[#allocation6 + $0x98] sm:$0xf0]  ;;  %v1719_v29 = vld [vmem:[%s2227_s10 + $0x30] sm:$0xff] }
  0x49   :  { %v1440_v42 = vor.u32 %v1683_v35, %v1437_v38  ;;  %v1701_v35 = vld [vmem:[%s2226_s9 + $0x20] sm:$0xff] }
  0x4a   :  { %786 = vmatpush.bf16.msrb.mxu0 %v1404_v45  ;;  %799 = vmatpush.bf16.msrb.mxu1 %v1468_v49  ;;  %v1665_v45 = vld [vmem:[#allocation6 + $0x4] sm:$0xf] }
  0x4b   :  { %v1681_v49 = vld [vmem:[#allocation6 + $0x84] sm:$0xf]  ;;  %v1368_v54 = vor.u32 %v1665_v45, %v1365_v48  ;;  %v1727_v45 = vld [vmem:[%s2227_s10 + $0x70] sm:$0xff] }
  0x4c   :  { %812 = vmatpush.bf16.msrb.mxu2 %v1408_v50  ;;  %825 = vmatpush.bf16.msrb.mxu3 %v1472_v53  ;;  %v1429_v50 = vld [vmem:[#allocation6 + $0x88] sm:$0xf0]  ;;  %v1428_v53 = vor.u32 %v1682_v44, %v1427_v43  ;;  %v1697_v48 = vld [vmem:[%s2226_s9] sm:$0xff] }
  0x4d   :  { %v1432_v55 = vor.u32 %v1681_v49, %v1429_v50  ;;  %v1718_v43 = vld [vmem:[%s2227_s10 + $0x28] sm:$0xff] }
  0x4e   :  { %787 = vmatpush.bf16.msrb.mxu0 %v1396_v56  ;;  %800 = vmatpush.bf16.msrb.mxu1 %v1460_v60  ;;  %v298_v56 = vld [vmem:[%s2221_s4] sm:$0xf]  ;;  %v1698_v44 = vld [vmem:[%s2226_s9 + $0x8] sm:$0xff] }
  0x4f   :  { %v300_v58 = vperm.slane %v298_v56, 0  ;;  %v301_v61 = vperm.slane %v298_v56, 1  ;;  %v302_v8 = vperm.slane %v298_v56, 2  ;;  %v1726_v49 = vld [vmem:[%s2227_s10 + $0x68] sm:$0xff] }
  0x50   :  { %813 = vmatpush.bf16.msrb.mxu2 %v1400_v0  ;;  %826 = vmatpush.bf16.msrb.mxu3 %v1464_v1  ;;  %v1706_v50 = vld [vmem:[%s2226_s9 + $0x48] sm:$0xff] }
  0x52   :  { %788 = vmatpush.bf16.msrb.mxu0 %v1388_v5  ;;  %801 = vmatpush.bf16.msrb.mxu1 %v1452_v9 }
  0x54   :  { %814 = vmatpush.bf16.msrb.mxu2 %v1392_v10  ;;  %827 = vmatpush.bf16.msrb.mxu3 %v1456_v14  ;;  %v303_v10 = vperm.slane %v298_v56, 3  ;;  %v1714_v56 = vld [vmem:[%s2227_s10 + $0x8] sm:$0xff] }
  0x56   :  { %789 = vmatpush.bf16.msrb.mxu0 %v1380_v19  ;;  %802 = vmatpush.bf16.msrb.mxu1 %v1444_v23 }
  0x58   :  { %815 = vmatpush.bf16.msrb.mxu2 %v1384_v24  ;;  %828 = vmatpush.bf16.msrb.mxu3 %v1448_v28  ;;  %v1711_v28 = vld [vmem:[%s2226_s9 + $0x70] sm:$0xff] }
  0x5a   :  { %790 = vmatpush.bf16.msrb.mxu0 %v1372_v32  ;;  %803 = vmatpush.bf16.msrb.mxu1 %v1436_v36  ;;  %v1710_v32 = vld [vmem:[%s2226_s9 + $0x68] sm:$0xff]  ;;  %v1709_v36 = vld [vmem:[%s2226_s9 + $0x60] sm:$0xff] }
  0x5c   :  { %816 = vmatpush.bf16.msrb.mxu2 %v1376_v37  ;;  %829 = vmatpush.bf16.msrb.mxu3 %v1440_v42  ;;  %v1708_v42 = vld [vmem:[%s2226_s9 + $0x58] sm:$0xff] }
  0x5e   :  { %791 = vmatpush.bf16.msrb.mxu0 %v1364_v52  ;;  %804 = vmatpush.bf16.msrb.mxu1 %v1428_v53  ;;  %v1725_v52 = vld [vmem:[%s2227_s10 + $0x60] sm:$0xff] }
  0x5f   :  { %v1705_v53 = vld [vmem:[%s2226_s9 + $0x40] sm:$0xff] }
  0x60   :  { %817 = vmatpush.bf16.msrb.mxu2 %v1368_v54  ;;  %830 = vmatpush.bf16.msrb.mxu3 %v1432_v55  ;;  %v1715_v54 = vld [vmem:[%s2227_s10 + $0x10] sm:$0xff]  ;;  %v1724_v55 = vld [vmem:[%s2227_s10 + $0x58] sm:$0xff] }
  0x96   :  { %v2100_v13 = vpop.f32.mrf.mxu0  ;;  %v2102_v15 = vpop.f32.mrf.mxu1 }
  0x9e   :  { %v186_v41 = vpop.f32.mrf.mxu2  ;;  %v199_v46 = vpop.f32.mrf.mxu3 }
  0x9f   :  { %v162_v47 = vpop.f32.mrf.mxu0  ;;  %v175_v51 = vpop.f32.mrf.mxu1 }
  0xa0   :  { %v1717_v47 = vld [vmem:[%s2227_s10 + $0x20] sm:$0xff]  ;;  %v1716_v51 = vld [vmem:[%s2227_s10 + $0x18] sm:$0xff] }
  0xa6   :  { %v188_v57 = vpop.f32.mrf.mxu2  ;;  %v201_v59 = vpop.f32.mrf.mxu3 }
  0xa7   :  { %v255_v60 = vpop.f32.mrf.mxu0  ;;  %v268_v63 = vpop.f32.mrf.mxu1  ;;  %v1723_v57 = vld [vmem:[%s2227_s10 + $0x50] sm:$0xff]  ;;  %v1722_v59 = vld [vmem:[%s2227_s10 + $0x48] sm:$0xff] }
  0xa8   :  { %v256_v62 = vadd.f32 %v255_v60, %v2100_v13  ;;  %v269_v0 = vadd.f32 %v268_v63, %v2102_v15  ;;  %v1704_v15 = vld [vmem:[%s2226_s9 + $0x38] sm:$0xff]  ;;  %v350_v60 = vld [vmem:[%s2223_s6] sm:$0x3] }
  0xaa   :  { %v308_v1 = vadd.f32 %v300_v58, %v256_v62  ;;  %v309_v2 = vadd.f32 %v301_v61, %v269_v0  ;;  %v1713_v58 = vld [vmem:[%s2227_s10] sm:$0xff]  ;;  %v352_v62 = vperm.slane %v350_v60, 0 }
  0xab   :  { %v1721_v61 = vld [vmem:[%s2227_s10 + $0x40] sm:$0xff] }
  0xac   :  { %v312_v3 = vmax.f32 %v308_v1, 0.0  ;;  %v313_v4 = vmax.f32 %v309_v2, 0.0 }
  0xae   :  { %v281_v5 = vpop.f32.mrf.mxu2  ;;  %v316_v6 = vpack.c.bf16 %v313_v4, %v312_v3  ;;  %v294_v9 = vpop.f32.mrf.mxu3  ;;  %v353_v3 = vperm.slane %v350_v60, 1 }
  0xaf   :  { %v282_v7 = vadd.f32 %v281_v5, %v186_v41  ;;  %v257_v11 = vpop.f32.mrf.mxu0  ;;  %v295_v12 = vadd.f32 %v294_v9, %v199_v46  ;;  %v270_v14 = vpop.f32.mrf.mxu1  ;;  %v1728_v41 = vld [vmem:[%s2227_s10 + $0x78] sm:$0xff]  ;;  %v1707_v46 = vld [vmem:[%s2226_s9 + $0x50] sm:$0xff] }
  0xb0   :  { %v357_v16 = vunpack.c.l.b16 %v316_v6  ;;  %v358_v17 = vunpack.c.h.b16 %v316_v6 }
  0xb1   :  { %v310_v18 = vadd.f32 %v302_v8, %v282_v7  ;;  %v311_v13 = vadd.f32 %v303_v10, %v295_v12  ;;  %v611_v12 = vld [vmem:[%s2225_s8] sm:$0x3] }
  0xb2   :  { %v359_v19 = vpack.c.b16 %v357_v16, %v357_v16  ;;  %v360_v20 = vpack.c.b16 %v358_v17, %v358_v17  ;;  %v613_v16 = vperm.slane %v611_v12, 0 }
  0xb3   :  { %v314_v24 = vmax.f32 %v310_v18, 0.0  ;;  %v315_v25 = vmax.f32 %v311_v13, 0.0 }
  0xb4   :  { %531 = vmatmul.bf16.vlgmr.msra.gmra.mxu0 %v359_v19  ;;  %544 = vmatmul.bf16.vlgmr.msra.gmra.mxu1 %v360_v20 }
  0xb5   :  { %557 = vmatmul.bf16.vlgmr.msra.gmra.mxu2 %v359_v19  ;;  %570 = vmatmul.bf16.vlgmr.msra.gmra.mxu3 %v360_v20  ;;  %v317_v30 = vpack.c.bf16 %v315_v25, %v314_v24 }
  0xb6   :  { %v283_v23 = vpop.f32.mrf.mxu2  ;;  %v296_v26 = vpop.f32.mrf.mxu3  ;;  %1122 = vmatpush.bf16.msra.mxu2 %v1704_v15  ;;  %1135 = vmatpush.bf16.msra.mxu3 %v1712_v21 }
  0xb7   :  { %1000 = vmatpush.bf16.msra.mxu0 %v1720_v22  ;;  %v618_v33 = vunpack.c.l.b16 %v317_v30  ;;  %v619_v34 = vunpack.c.h.b16 %v317_v30  ;;  %1013 = vmatpush.bf16.msra.mxu1 %v1728_v41  ;;  %v614_v22 = vperm.slane %v611_v12, 1 }
  0xb9   :  { %v620_v37 = vpack.c.b16 %v618_v33, %v618_v33  ;;  %v621_v38 = vpack.c.b16 %v619_v34, %v619_v34 }
  0xba   :  { %1123 = vmatpush.bf16.msra.mxu2 %v1703_v27  ;;  %1136 = vmatpush.bf16.msra.mxu3 %v1711_v28 }
  0xbb   :  { %1001 = vmatpush.bf16.msra.mxu0 %v1719_v29  ;;  %1014 = vmatpush.bf16.msra.mxu1 %v1727_v45 }
  0xbe   :  { %1124 = vmatpush.bf16.msra.mxu2 %v1702_v31  ;;  %1137 = vmatpush.bf16.msra.mxu3 %v1710_v32 }
  0xbf   :  { %1002 = vmatpush.bf16.msra.mxu0 %v1718_v43  ;;  %1015 = vmatpush.bf16.msra.mxu1 %v1726_v49 }
  0xc2   :  { %1125 = vmatpush.bf16.msra.mxu2 %v1701_v35  ;;  %1138 = vmatpush.bf16.msra.mxu3 %v1709_v36 }
  0xc3   :  { %1003 = vmatpush.bf16.msra.mxu0 %v1717_v47  ;;  %1016 = vmatpush.bf16.msra.mxu1 %v1725_v52 }
  0xc4   :  { %792 = vmatmul.bf16.vlgmr.msrb.gmra.mxu0 %v620_v37  ;;  %805 = vmatmul.bf16.vlgmr.msrb.gmra.mxu1 %v621_v38 }
  0xc5   :  { %818 = vmatmul.bf16.vlgmr.msrb.gmra.mxu2 %v620_v37  ;;  %831 = vmatmul.bf16.vlgmr.msrb.gmra.mxu3 %v621_v38 }
  0xc6   :  { %1126 = vmatpush.bf16.msra.mxu2 %v1700_v39  ;;  %1139 = vmatpush.bf16.msra.mxu3 %v1708_v42 }
  0xc7   :  { %1004 = vmatpush.bf16.msra.mxu0 %v1716_v51  ;;  %1017 = vmatpush.bf16.msra.mxu1 %v1724_v55 }
  0xca   :  { %1127 = vmatpush.bf16.msra.mxu2 %v1699_v40  ;;  %1140 = vmatpush.bf16.msra.mxu3 %v1707_v46 }
  0xcb   :  { %1005 = vmatpush.bf16.msra.mxu0 %v1715_v54  ;;  %1018 = vmatpush.bf16.msra.mxu1 %v1723_v57 }
  0xce   :  { %1128 = vmatpush.bf16.msra.mxu2 %v1698_v44  ;;  %1141 = vmatpush.bf16.msra.mxu3 %v1706_v50  ;;  %v1736_v44 = vld [vmem:[%s2228_s11] ss:$0 sm:$0xff] }
  0xcf   :  { %1006 = vmatpush.bf16.msra.mxu0 %v1714_v56  ;;  %1019 = vmatpush.bf16.msra.mxu1 %v1722_v59 }
  0xd2   :  { %1129 = vmatpush.bf16.msra.mxu2 %v1697_v48  ;;  %1142 = vmatpush.bf16.msra.mxu3 %v1705_v53 }
  0xd3   :  { %1007 = vmatpush.bf16.msra.mxu0 %v1713_v58  ;;  %1020 = vmatpush.bf16.msra.mxu1 %v1721_v61 }
 0x131   :  { %v532_v63 = vpop.f32.mrf.mxu0  ;;  %v545_v0 = vpop.f32.mrf.mxu1 }
 0x132   :  { %v533_v1 = vadd.f32 %v532_v63, %v352_v62 }
 0x134   :  { %v546_v2 = vadd.f32 %v545_v0, %v533_v1 }
 0x136   :  { %v575_v4 = vmax.f32 %v546_v2, 0.0 }
 0x138   :  { %v577_v5 = vpack.c.bf16 %v575_v4, %v575_v4  ;;  %v558_v6 = vpop.f32.mrf.mxu2  ;;  %v571_v7 = vpop.f32.mrf.mxu3 }
 0x139   :  { %v559_v8 = vadd.f32 %v558_v6, %v353_v3  ;;  %v534_v9 = vpop.f32.mrf.mxu0  ;;  %v547_v10 = vpop.f32.mrf.mxu1 }
 0x13a   :  { %1130 = vmatmul.bf16.vlgmr.msra.gmra.mxu2 %v577_v5 }
 0x13b   :  { %v572_v11 = vadd.f32 %v571_v7, %v559_v8 }
 0x13d   :  { %v576_v14 = vmax.f32 %v572_v11, 0.0 }
 0x13f   :  { %v578_v17 = vpack.c.bf16 %v576_v14, %v576_v14 }
 0x140   :  { %v560_v18 = vpop.f32.mrf.mxu2  ;;  %v573_v13 = vpop.f32.mrf.mxu3 }
 0x141   :  { %1143 = vmatmul.bf16.vlgmr.msra.gmra.mxu3 %v578_v17  ;;  %v793_v19 = vpop.f32.mrf.mxu0  ;;  %v806_v20 = vpop.f32.mrf.mxu1 }
 0x142   :  { %v794_v15 = vadd.f32 %v793_v19, %v613_v16 }
 0x144   :  { %v807_v21 = vadd.f32 %v806_v20, %v794_v15 }
 0x146   :  { %v836_v23 = vmax.f32 %v807_v21, 0.0 }
 0x148   :  { %v838_v24 = vpack.c.bf16 %v836_v23, %v836_v23  ;;  %v819_v25 = vpop.f32.mrf.mxu2  ;;  %v832_v26 = vpop.f32.mrf.mxu3 }
 0x149   :  { %v820_v27 = vadd.f32 %v819_v25, %v614_v22  ;;  %v795_v28 = vpop.f32.mrf.mxu0  ;;  %v808_v29 = vpop.f32.mrf.mxu1 }
 0x14a   :  { %1008 = vmatmul.bf16.vlgmr.msra.gmra.mxu0 %v838_v24 }
 0x14b   :  { %v833_v30 = vadd.f32 %v832_v26, %v820_v27 }
 0x14d   :  { %v837_v31 = vmax.f32 %v833_v30, 0.0 }
 0x14f   :  { %v839_v32 = vpack.c.bf16 %v837_v31, %v837_v31 }
 0x150   :  { %v821_v33 = vpop.f32.mrf.mxu2  ;;  %v834_v34 = vpop.f32.mrf.mxu3 }
 0x151   :  { %1021 = vmatmul.bf16.vlgmr.msra.gmra.mxu1 %v839_v32 }
 0x1bd   :  { %v1131_v35 = vpop.f32.mrf.mxu2 }
 0x1c4   :  { %v1144_v36 = vpop.f32.mrf.mxu3 }
 0x1c5   :  { %v1133_v37 = vpop.f32.mrf.mxu2 }
 0x1c7   :  { %v1009_v38 = vpop.f32.mrf.mxu0 }
 0x1cc   :  { %v1146_v39 = vpop.f32.mrf.mxu3 }
 0x1ce   :  { %v1022_v40 = vpop.f32.mrf.mxu1 }
 0x1cf   :  { %v1023_v41 = vadd.f32 %v1022_v40, %v1009_v38  ;;  %v1011_v42 = vpop.f32.mrf.mxu0 }
 0x1d1   :  { %v1132_v43 = vadd.f32 %v1131_v35, %v1023_v41 }
 0x1d3   :  { %v1145_v45 = vadd.f32 %v1144_v36, %v1132_v43 }
 0x1d5   :  { %v1152_v46 = vadd.f32 %v1736_v44, %v1145_v45 }
 0x1d6   :  { %v1024_v47 = vpop.f32.mrf.mxu1 }
 0x1d7   :  { %1154 = vst.msk [vmem:[%s2229_s12] sm:$0xff] %vm1153_vm1, %v1152_v46 }
 0x1d8   :  { %1159 = vsyncpa [#allocation3], 1 }
 0x1d9   :  { %1160 = vsyncpa [#allocation5], 1 }

</bundles_post_ra>
